<compile_context>
chip_gen: v7x
topology: tpu7x:2x2x1
jax: 0.10.0
libtpu: 0.0.40
codegen_flags: <defaults>
</compile_context>

<pallas_src>
import math
import functools
from typing import NamedTuple, Tuple

import jax
import jax.numpy as jnp
from jax.experimental import pallas as pl
from jax.experimental.pallas import tpu as pltpu


# Synthetic BOND_TYPE vocabulary (mirrors the dict-of-lists the module expects).
BOND_TYPE = {
    "bond_type": ["SINGLE", "DOUBLE", "TRIPLE", "AROMATIC", "MISC"],   # 5
    "stereo": ["NONE", "Z", "E", "CIS", "TRANS", "ANY"],               # 6
    "is_conjugated": ["FALSE", "TRUE"],                                # 2
}


class BondEmbedMeta(NamedTuple):
    """Static (hashable) metadata derived once from the embedding tables."""
    vocab_sizes: Tuple[int, ...]
    offsets: Tuple[int, ...]      # start of each feature's range in concat vocab
    num_features: int
    embed_dim: int
    v_pad: int                    # concat vocab padded to a multiple of 8
    pack: int                     # tokens packed per output row (P)


def _choose_pack(embed_dim: int) -> int:
    """Tokens per output row so the output block is lane-dense (>=128 lanes).

    256 lanes on v6e/v7x (256-wide MXU); 128 lanes on v5e (128-wide MXU,
    single vst slot -> lane density matters most, wider N buys nothing).
    """
    lane_target = 256
    try:
        kind = jax.devices()[0].device_kind.lower()
        if "v5" in kind and ("lite" in kind or "v5e" in kind):
            lane_target = 128
    except Exception:
        pass
    if lane_target % embed_dim == 0:
        return lane_target // embed_dim
    if 128 % embed_dim == 0:
        return 128 // embed_dim
    return 1  # fallback: still correct, but stores become masked again


def prepare_bond_embedding(tables, pack: int | None = None):
    """One-time init: concat + pre-scale + pad + block-diagonalize the tables.

    Hoisted out of the per-call path — the block-diagonal table is a static
    model parameter.
    """
    F = len(tables)
    D = int(tables[0].shape[1])
    vocab_sizes = tuple(int(t.shape[0]) for t in tables)
    offsets = tuple(int(sum(vocab_sizes[:i])) for i in range(F))
    total_vocab = sum(vocab_sizes)
    v_pad = -(-total_vocab // 8) * 8          # sublane alignment only (16 here)
    if pack is None:
        pack = _choose_pack(D)

    scale = 1.0 / math.sqrt(F)
    base = jnp.concatenate([t.astype(jnp.float32) for t in tables], axis=0)
    base = scale * base                       # fold 1/sqrt(F) into the weights
    base = jnp.pad(base, ((0, v_pad - total_vocab), (0, 0)))        # (v_pad, D)

    # Block-diagonal table: token slot p of a packed row only touches rows
    # [p*v_pad, (p+1)*v_pad) and columns [p*D, (p+1)*D), so a single matmul
    # embeds `pack` tokens into lane-dense output columns.
    table = jnp.zeros((pack * v_pad, pack * D), jnp.float32)
    for p in range(pack):
        table = table.at[p * v_pad:(p + 1) * v_pad, p * D:(p + 1) * D].set(base)

    meta = BondEmbedMeta(vocab_sizes, offsets, F, D, v_pad, pack)
    return table, meta


def bond_embed_kernel(idx_ref, table_ref, out_ref, *, meta: BondEmbedMeta):
    """One grid step: embed a tile of P-token-packed rows.

    idx_ref:   (tile_rows, P*F) int32 raw bond-feature indices
               (row r, cols [p*F:(p+1)*F] = features of token r*P + p).
    table_ref: (P*v_pad, P*D) f32 block-diagonal pre-scaled table (resident).
    out_ref:   (tile_rows, P*D) f32 lane-dense output tile.
    """
    P, F, v_pad = meta.pack, meta.num_features, meta.v_pad
    idx = idx_ref[...]                                     # (tile_rows, P*F)
    tile_rows = idx.shape[0]
    K = P * v_pad
    iota = jax.lax.broadcasted_iota(jnp.int32, (tile_rows, K), 1)

    # Multi-hot over the packed concatenated vocab.  Per-feature sub-ranges
    # (and per-slot blocks) are disjoint by construction, so a boolean OR plus
    # one cast replaces P*F float accumulates.
    mask = None
    for p in range(P):
        for f in range(F):
            col = p * F + f
            # PyTorch nn.Embedding would raise on out-of-range indices; we
            # clamp instead (behavioral divergence, documented).
            feat = jnp.clip(idx[:, col:col + 1], 0, meta.vocab_sizes[f] - 1)
            feat = feat + (meta.offsets[f] + p * v_pad)    # (tile_rows, 1)
            hit = iota == feat                             # (tile_rows, K) bool
            mask = hit if mask is None else (mask | hit)
    counts = mask.astype(jnp.float32)

    # Sum of per-feature (pre-scaled) embeddings for every packed token slot.
    out = jnp.dot(counts, table_ref[...], preferred_element_type=jnp.float32)
    out_ref[...] = out.astype(out_ref.dtype)


@functools.partial(jax.jit, static_argnames=("meta", "tile_tokens"))
def bond_embedding_forward(feats, table, meta: BondEmbedMeta,
                           tile_tokens: int = 4096):
    """feats: (B, E, F) int indices.  table/meta from prepare_bond_embedding."""
    B, E, F = feats.shape
    assert F == meta.num_features
    D, P = meta.embed_dim, meta.pack

    idx = feats.reshape(-1, F).astype(jnp.int32)
    n = idx.shape[0]

    rows = -(-n // P)                                   # packed rows needed
    tile_rows = min(tile_tokens // P, -(-rows // 8) * 8)
    tile_rows = max(8, (tile_rows // 8) * 8)            # multiple of 8
    rows_pad = -(-rows // tile_rows) * tile_rows
    n_pad = rows_pad * P

    # Padding tokens get index 0 (a valid index); their rows are sliced off.
    idx = jnp.pad(idx, ((0, n_pad - n), (0, 0)))
    idx = idx.reshape(rows_pad, P * F)                  # row-major token packing

    kernel = functools.partial(bond_embed_kernel, meta=meta)
    out = pl.pallas_call(
        kernel,
        out_shape=jax.ShapeDtypeStruct((rows_pad, P * D), jnp.float32),
        grid_spec=pltpu.PrefetchScalarGridSpec(
            num_scalar_prefetch=0,
            grid=(rows_pad // tile_rows,),
            in_specs=[
                # raw packed-row indices (last dim == full array dim)
                pl.BlockSpec((tile_rows, P * F), lambda i: (i, 0)),
                # block-diagonal table, resident across the whole grid
                pl.BlockSpec((P * meta.v_pad, P * D), lambda i: (0, 0)),
            ],
            out_specs=pl.BlockSpec((tile_rows, P * D), lambda i: (i, 0)),
        ),
        compiler_params=pltpu.CompilerParams(
            dimension_semantics=("parallel",)),
    )(idx, table)

    # Row-major reshape of (rows_pad, P*D) -> (n_pad, D) IS the un-packing.
    return out.reshape(n_pad, D)[:n].reshape(B, E, D)


def bond_embedding_reference(feats, tables):
    """Pure-JAX reference matching the PyTorch forward."""
    F = feats.shape[-1]
    scale = 1.0 / math.sqrt(F)
    out = 0.0
    for i in range(F):
        out = out + scale * tables[i][feats[..., i]]
    return out


if __name__ == "__main__":
    key = jax.random.PRNGKey(0)

    embed_dim = 32
    B, E = 2, 8                        # batch of 2 molecules, 8 bonds each
    vocab_sizes = [len(v) for v in BOND_TYPE.values()]
    F = len(vocab_sizes)

    # Deterministic parameter init (nn.Embedding default: N(0, 1)).
    tkeys = jax.random.split(key, F + 1)
    tables = [
        jax.random.normal(tkeys[i], (vocab_sizes[i], embed_dim), jnp.float32)
        for i in range(F)
    ]

    # Deterministic integer bond features in each feature's valid range.
    fkeys = jax.random.split(tkeys[-1], F)
    feats = jnp.stack(
        [
            jax.random.randint(fkeys[i], (B, E), 0, vocab_sizes[i], jnp.int32)
            for i in range(F)
        ],
        axis=-1,
    )  # (B, E, F)

    # One-time parameter prep (hoisted out of the per-call path).
    concat_table, meta = prepare_bond_embedding(tables)

    out = bond_embedding_forward(feats, concat_table, meta)
    out = jax.block_until_ready(out)

    ref = bond_embedding_reference(feats, tables)
    assert out.shape == (B, E, embed_dim)
    assert jnp.allclose(out, ref, atol=1e-5, rtol=1e-5), "mismatch vs reference"

    print("KERNEL_OK")
</pallas_src>

<mosaic_0001>
module attributes {stable_mosaic.version = 11 : i64} {
  func.func @bond_embed_kernel(%arg0: i32, %arg1: memref<8x24xi32, #tpu.memory_space<vmem>>, %arg2: memref<128x256xf32, #tpu.memory_space<vmem>>, %arg3: memref<8x256xf32, #tpu.memory_space<vmem>>) attributes {dimension_semantics = [#tpu.dimension_semantics<parallel>], iteration_bounds = array<i64: 1>, scalar_prefetch = 0 : i64, scratch_operands = 0 : i64, tpu.core_type = #tpu.core_type<tc>, window_params = [{transform_indices = @transform_0, window_bounds = array<i64: 8, 24>}, {pipeline_mode = #tpu.pipeline_mode<synchronous>, transform_indices = @transform_1, window_bounds = array<i64: 128, 256>}, {transform_indices = @transform_2, window_bounds = array<i64: 8, 256>}]} {
    %c0 = arith.constant 0 : index
    %c0_0 = arith.constant 0 : index
    %0 = vector.load %arg1[%c0, %c0_0] : memref<8x24xi32, #tpu.memory_space<vmem>>, vector<8x24xi32>
    %1 = tpu.iota {dimensions = array<i32: 1>} : vector<8x128xi32>
    %2 = vector.extract_strided_slice %0 {offsets = [0, 0], sizes = [8, 1], strides = [1, 1]} : vector<8x24xi32> to vector<8x1xi32>
    %c0_i32 = arith.constant 0 : i32
    %c4_i32 = arith.constant 4 : i32
    %3 = vector.broadcast %c0_i32 : i32 to vector<8x1xi32>
    %4 = arith.maxsi %3, %2 : vector<8x1xi32>
    %5 = vector.broadcast %c4_i32 : i32 to vector<8x1xi32>
    %6 = arith.minsi %5, %4 : vector<8x1xi32>
    %c0_i32_1 = arith.constant 0 : i32
    %7 = vector.broadcast %c0_i32_1 : i32 to vector<8x1xi32>
    %8 = arith.addi %6, %7 : vector<8x1xi32>
    %9 = vector.broadcast %8 : vector<8x1xi32> to vector<8x128xi32>
    %10 = arith.cmpi eq, %1, %9 : vector<8x128xi32>
    %11 = vector.extract_strided_slice %0 {offsets = [0, 1], sizes = [8, 1], strides = [1, 1]} : vector<8x24xi32> to vector<8x1xi32>
    %c0_i32_2 = arith.constant 0 : i32
    %c5_i32 = arith.constant 5 : i32
    %12 = vector.broadcast %c0_i32_2 : i32 to vector<8x1xi32>
    %13 = arith.maxsi %12, %11 : vector<8x1xi32>
    %14 = vector.broadcast %c5_i32 : i32 to vector<8x1xi32>
    %15 = arith.minsi %14, %13 : vector<8x1xi32>
    %c5_i32_3 = arith.constant 5 : i32
    %16 = vector.broadcast %c5_i32_3 : i32 to vector<8x1xi32>
    %17 = arith.addi %15, %16 : vector<8x1xi32>
    %18 = vector.broadcast %17 : vector<8x1xi32> to vector<8x128xi32>
    %19 = arith.cmpi eq, %1, %18 : vector<8x128xi32>
    %20 = arith.ori %10, %19 : vector<8x128xi1>
    %21 = vector.extract_strided_slice %0 {offsets = [0, 2], sizes = [8, 1], strides = [1, 1]} : vector<8x24xi32> to vector<8x1xi32>
    %c0_i32_4 = arith.constant 0 : i32
    %c1_i32 = arith.constant 1 : i32
    %22 = vector.broadcast %c0_i32_4 : i32 to vector<8x1xi32>
    %23 = arith.maxsi %22, %21 : vector<8x1xi32>
    %24 = vector.broadcast %c1_i32 : i32 to vector<8x1xi32>
    %25 = arith.minsi %24, %23 : vector<8x1xi32>
    %c11_i32 = arith.constant 11 : i32
    %26 = vector.broadcast %c11_i32 : i32 to vector<8x1xi32>
    %27 = arith.addi %25, %26 : vector<8x1xi32>
    %28 = vector.broadcast %27 : vector<8x1xi32> to vector<8x128xi32>
    %29 = arith.cmpi eq, %1, %28 : vector<8x128xi32>
    %30 = arith.ori %20, %29 : vector<8x128xi1>
    %31 = vector.extract_strided_slice %0 {offsets = [0, 3], sizes = [8, 1], strides = [1, 1]} : vector<8x24xi32> to vector<8x1xi32>
    %c0_i32_5 = arith.constant 0 : i32
    %c4_i32_6 = arith.constant 4 : i32
    %32 = vector.broadcast %c0_i32_5 : i32 to vector<8x1xi32>
    %33 = arith.maxsi %32, %31 : vector<8x1xi32>
    %34 = vector.broadcast %c4_i32_6 : i32 to vector<8x1xi32>
    %35 = arith.minsi %34, %33 : vector<8x1xi32>
    %c16_i32 = arith.constant 16 : i32
    %36 = vector.broadcast %c16_i32 : i32 to vector<8x1xi32>
    %37 = arith.addi %35, %36 : vector<8x1xi32>
    %38 = vector.broadcast %37 : vector<8x1xi32> to vector<8x128xi32>
    %39 = arith.cmpi eq, %1, %38 : vector<8x128xi32>
    %40 = arith.ori %30, %39 : vector<8x128xi1>
    %41 = vector.extract_strided_slice %0 {offsets = [0, 4], sizes = [8, 1], strides = [1, 1]} : vector<8x24xi32> to vector<8x1xi32>
    %c0_i32_7 = arith.constant 0 : i32
    %c5_i32_8 = arith.constant 5 : i32
    %42 = vector.broadcast %c0_i32_7 : i32 to vector<8x1xi32>
    %43 = arith.maxsi %42, %41 : vector<8x1xi32>
    %44 = vector.broadcast %c5_i32_8 : i32 to vector<8x1xi32>
    %45 = arith.minsi %44, %43 : vector<8x1xi32>
    %c21_i32 = arith.constant 21 : i32
    %46 = vector.broadcast %c21_i32 : i32 to vector<8x1xi32>
    %47 = arith.addi %45, %46 : vector<8x1xi32>
    %48 = vector.broadcast %47 : vector<8x1xi32> to vector<8x128xi32>
    %49 = arith.cmpi eq, %1, %48 : vector<8x128xi32>
    %50 = arith.ori %40, %49 : vector<8x128xi1>
    %51 = vector.extract_strided_slice %0 {offsets = [0, 5], sizes = [8, 1], strides = [1, 1]} : vector<8x24xi32> to vector<8x1xi32>
    %c0_i32_9 = arith.constant 0 : i32
    %c1_i32_10 = arith.constant 1 : i32
    %52 = vector.broadcast %c0_i32_9 : i32 to vector<8x1xi32>
    %53 = arith.maxsi %52, %51 : vector<8x1xi32>
    %54 = vector.broadcast %c1_i32_10 : i32 to vector<8x1xi32>
    %55 = arith.minsi %54, %53 : vector<8x1xi32>
    %c27_i32 = arith.constant 27 : i32
    %56 = vector.broadcast %c27_i32 : i32 to vector<8x1xi32>
    %57 = arith.addi %55, %56 : vector<8x1xi32>
    %58 = vector.broadcast %57 : vector<8x1xi32> to vector<8x128xi32>
    %59 = arith.cmpi eq, %1, %58 : vector<8x128xi32>
    %60 = arith.ori %50, %59 : vector<8x128xi1>
    %61 = vector.extract_strided_slice %0 {offsets = [0, 6], sizes = [8, 1], strides = [1, 1]} : vector<8x24xi32> to vector<8x1xi32>
    %c0_i32_11 = arith.constant 0 : i32
    %c4_i32_12 = arith.constant 4 : i32
    %62 = vector.broadcast %c0_i32_11 : i32 to vector<8x1xi32>
    %63 = arith.maxsi %62, %61 : vector<8x1xi32>
    %64 = vector.broadcast %c4_i32_12 : i32 to vector<8x1xi32>
    %65 = arith.minsi %64, %63 : vector<8x1xi32>
    %c32_i32 = arith.constant 32 : i32
    %66 = vector.broadcast %c32_i32 : i32 to vector<8x1xi32>
    %67 = arith.addi %65, %66 : vector<8x1xi32>
    %68 = vector.broadcast %67 : vector<8x1xi32> to vector<8x128xi32>
    %69 = arith.cmpi eq, %1, %68 : vector<8x128xi32>
    %70 = arith.ori %60, %69 : vector<8x128xi1>
    %71 = vector.extract_strided_slice %0 {offsets = [0, 7], sizes = [8, 1], strides = [1, 1]} : vector<8x24xi32> to vector<8x1xi32>
    %c0_i32_13 = arith.constant 0 : i32
    %c5_i32_14 = arith.constant 5 : i32
    %72 = vector.broadcast %c0_i32_13 : i32 to vector<8x1xi32>
    %73 = arith.maxsi %72, %71 : vector<8x1xi32>
    %74 = vector.broadcast %c5_i32_14 : i32 to vector<8x1xi32>
    %75 = arith.minsi %74, %73 : vector<8x1xi32>
    %c37_i32 = arith.constant 37 : i32
    %76 = vector.broadcast %c37_i32 : i32 to vector<8x1xi32>
    %77 = arith.addi %75, %76 : vector<8x1xi32>
    %78 = vector.broadcast %77 : vector<8x1xi32> to vector<8x128xi32>
    %79 = arith.cmpi eq, %1, %78 : vector<8x128xi32>
    %80 = arith.ori %70, %79 : vector<8x128xi1>
    %81 = vector.extract_strided_slice %0 {offsets = [0, 8], sizes = [8, 1], strides = [1, 1]} : vector<8x24xi32> to vector<8x1xi32>
    %c0_i32_15 = arith.constant 0 : i32
    %c1_i32_16 = arith.constant 1 : i32
    %82 = vector.broadcast %c0_i32_15 : i32 to vector<8x1xi32>
    %83 = arith.maxsi %82, %81 : vector<8x1xi32>
    %84 = vector.broadcast %c1_i32_16 : i32 to vector<8x1xi32>
    %85 = arith.minsi %84, %83 : vector<8x1xi32>
    %c43_i32 = arith.constant 43 : i32
    %86 = vector.broadcast %c43_i32 : i32 to vector<8x1xi32>
    %87 = arith.addi %85, %86 : vector<8x1xi32>
    %88 = vector.broadcast %87 : vector<8x1xi32> to vector<8x128xi32>
    %89 = arith.cmpi eq, %1, %88 : vector<8x128xi32>
    %90 = arith.ori %80, %89 : vector<8x128xi1>
    %91 = vector.extract_strided_slice %0 {offsets = [0, 9], sizes = [8, 1], strides = [1, 1]} : vector<8x24xi32> to vector<8x1xi32>
    %c0_i32_17 = arith.constant 0 : i32
    %c4_i32_18 = arith.constant 4 : i32
    %92 = vector.broadcast %c0_i32_17 : i32 to vector<8x1xi32>
    %93 = arith.maxsi %92, %91 : vector<8x1xi32>
    %94 = vector.broadcast %c4_i32_18 : i32 to vector<8x1xi32>
    %95 = arith.minsi %94, %93 : vector<8x1xi32>
    %c48_i32 = arith.constant 48 : i32
    %96 = vector.broadcast %c48_i32 : i32 to vector<8x1xi32>
    %97 = arith.addi %95, %96 : vector<8x1xi32>
    %98 = vector.broadcast %97 : vector<8x1xi32> to vector<8x128xi32>
    %99 = arith.cmpi eq, %1, %98 : vector<8x128xi32>
    %100 = arith.ori %90, %99 : vector<8x128xi1>
    %101 = vector.extract_strided_slice %0 {offsets = [0, 10], sizes = [8, 1], strides = [1, 1]} : vector<8x24xi32> to vector<8x1xi32>
    %c0_i32_19 = arith.constant 0 : i32
    %c5_i32_20 = arith.constant 5 : i32
    %102 = vector.broadcast %c0_i32_19 : i32 to vector<8x1xi32>
    %103 = arith.maxsi %102, %101 : vector<8x1xi32>
    %104 = vector.broadcast %c5_i32_20 : i32 to vector<8x1xi32>
    %105 = arith.minsi %104, %103 : vector<8x1xi32>
    %c53_i32 = arith.constant 53 : i32
    %106 = vector.broadcast %c53_i32 : i32 to vector<8x1xi32>
    %107 = arith.addi %105, %106 : vector<8x1xi32>
    %108 = vector.broadcast %107 : vector<8x1xi32> to vector<8x128xi32>
    %109 = arith.cmpi eq, %1, %108 : vector<8x128xi32>
    %110 = arith.ori %100, %109 : vector<8x128xi1>
    %111 = vector.extract_strided_slice %0 {offsets = [0, 11], sizes = [8, 1], strides = [1, 1]} : vector<8x24xi32> to vector<8x1xi32>
    %c0_i32_21 = arith.constant 0 : i32
    %c1_i32_22 = arith.constant 1 : i32
    %112 = vector.broadcast %c0_i32_21 : i32 to vector<8x1xi32>
    %113 = arith.maxsi %112, %111 : vector<8x1xi32>
    %114 = vector.broadcast %c1_i32_22 : i32 to vector<8x1xi32>
    %115 = arith.minsi %114, %113 : vector<8x1xi32>
    %c59_i32 = arith.constant 59 : i32
    %116 = vector.broadcast %c59_i32 : i32 to vector<8x1xi32>
    %117 = arith.addi %115, %116 : vector<8x1xi32>
    %118 = vector.broadcast %117 : vector<8x1xi32> to vector<8x128xi32>
    %119 = arith.cmpi eq, %1, %118 : vector<8x128xi32>
    %120 = arith.ori %110, %119 : vector<8x128xi1>
    %121 = vector.extract_strided_slice %0 {offsets = [0, 12], sizes = [8, 1], strides = [1, 1]} : vector<8x24xi32> to vector<8x1xi32>
    %c0_i32_23 = arith.constant 0 : i32
    %c4_i32_24 = arith.constant 4 : i32
    %122 = vector.broadcast %c0_i32_23 : i32 to vector<8x1xi32>
    %123 = arith.maxsi %122, %121 : vector<8x1xi32>
    %124 = vector.broadcast %c4_i32_24 : i32 to vector<8x1xi32>
    %125 = arith.minsi %124, %123 : vector<8x1xi32>
    %c64_i32 = arith.constant 64 : i32
    %126 = vector.broadcast %c64_i32 : i32 to vector<8x1xi32>
    %127 = arith.addi %125, %126 : vector<8x1xi32>
    %128 = vector.broadcast %127 : vector<8x1xi32> to vector<8x128xi32>
    %129 = arith.cmpi eq, %1, %128 : vector<8x128xi32>
    %130 = arith.ori %120, %129 : vector<8x128xi1>
    %131 = vector.extract_strided_slice %0 {offsets = [0, 13], sizes = [8, 1], strides = [1, 1]} : vector<8x24xi32> to vector<8x1xi32>
    %c0_i32_25 = arith.constant 0 : i32
    %c5_i32_26 = arith.constant 5 : i32
    %132 = vector.broadcast %c0_i32_25 : i32 to vector<8x1xi32>
    %133 = arith.maxsi %132, %131 : vector<8x1xi32>
    %134 = vector.broadcast %c5_i32_26 : i32 to vector<8x1xi32>
    %135 = arith.minsi %134, %133 : vector<8x1xi32>
    %c69_i32 = arith.constant 69 : i32
    %136 = vector.broadcast %c69_i32 : i32 to vector<8x1xi32>
    %137 = arith.addi %135, %136 : vector<8x1xi32>
    %138 = vector.broadcast %137 : vector<8x1xi32> to vector<8x128xi32>
    %139 = arith.cmpi eq, %1, %138 : vector<8x128xi32>
    %140 = arith.ori %130, %139 : vector<8x128xi1>
    %141 = vector.extract_strided_slice %0 {offsets = [0, 14], sizes = [8, 1], strides = [1, 1]} : vector<8x24xi32> to vector<8x1xi32>
    %c0_i32_27 = arith.constant 0 : i32
    %c1_i32_28 = arith.constant 1 : i32
    %142 = vector.broadcast %c0_i32_27 : i32 to vector<8x1xi32>
    %143 = arith.maxsi %142, %141 : vector<8x1xi32>
    %144 = vector.broadcast %c1_i32_28 : i32 to vector<8x1xi32>
    %145 = arith.minsi %144, %143 : vector<8x1xi32>
    %c75_i32 = arith.constant 75 : i32
    %146 = vector.broadcast %c75_i32 : i32 to vector<8x1xi32>
    %147 = arith.addi %145, %146 : vector<8x1xi32>
    %148 = vector.broadcast %147 : vector<8x1xi32> to vector<8x128xi32>
    %149 = arith.cmpi eq, %1, %148 : vector<8x128xi32>
    %150 = arith.ori %140, %149 : vector<8x128xi1>
    %151 = vector.extract_strided_slice %0 {offsets = [0, 15], sizes = [8, 1], strides = [1, 1]} : vector<8x24xi32> to vector<8x1xi32>
    %c0_i32_29 = arith.constant 0 : i32
    %c4_i32_30 = arith.constant 4 : i32
    %152 = vector.broadcast %c0_i32_29 : i32 to vector<8x1xi32>
    %153 = arith.maxsi %152, %151 : vector<8x1xi32>
    %154 = vector.broadcast %c4_i32_30 : i32 to vector<8x1xi32>
    %155 = arith.minsi %154, %153 : vector<8x1xi32>
    %c80_i32 = arith.constant 80 : i32
    %156 = vector.broadcast %c80_i32 : i32 to vector<8x1xi32>
    %157 = arith.addi %155, %156 : vector<8x1xi32>
    %158 = vector.broadcast %157 : vector<8x1xi32> to vector<8x128xi32>
    %159 = arith.cmpi eq, %1, %158 : vector<8x128xi32>
    %160 = arith.ori %150, %159 : vector<8x128xi1>
    %161 = vector.extract_strided_slice %0 {offsets = [0, 16], sizes = [8, 1], strides = [1, 1]} : vector<8x24xi32> to vector<8x1xi32>
    %c0_i32_31 = arith.constant 0 : i32
    %c5_i32_32 = arith.constant 5 : i32
    %162 = vector.broadcast %c0_i32_31 : i32 to vector<8x1xi32>
    %163 = arith.maxsi %162, %161 : vector<8x1xi32>
    %164 = vector.broadcast %c5_i32_32 : i32 to vector<8x1xi32>
    %165 = arith.minsi %164, %163 : vector<8x1xi32>
    %c85_i32 = arith.constant 85 : i32
    %166 = vector.broadcast %c85_i32 : i32 to vector<8x1xi32>
    %167 = arith.addi %165, %166 : vector<8x1xi32>
    %168 = vector.broadcast %167 : vector<8x1xi32> to vector<8x128xi32>
    %169 = arith.cmpi eq, %1, %168 : vector<8x128xi32>
    %170 = arith.ori %160, %169 : vector<8x128xi1>
    %171 = vector.extract_strided_slice %0 {offsets = [0, 17], sizes = [8, 1], strides = [1, 1]} : vector<8x24xi32> to vector<8x1xi32>
    %c0_i32_33 = arith.constant 0 : i32
    %c1_i32_34 = arith.constant 1 : i32
    %172 = vector.broadcast %c0_i32_33 : i32 to vector<8x1xi32>
    %173 = arith.maxsi %172, %171 : vector<8x1xi32>
    %174 = vector.broadcast %c1_i32_34 : i32 to vector<8x1xi32>
    %175 = arith.minsi %174, %173 : vector<8x1xi32>
    %c91_i32 = arith.constant 91 : i32
    %176 = vector.broadcast %c91_i32 : i32 to vector<8x1xi32>
    %177 = arith.addi %175, %176 : vector<8x1xi32>
    %178 = vector.broadcast %177 : vector<8x1xi32> to vector<8x128xi32>
    %179 = arith.cmpi eq, %1, %178 : vector<8x128xi32>
    %180 = arith.ori %170, %179 : vector<8x128xi1>
    %181 = vector.extract_strided_slice %0 {offsets = [0, 18], sizes = [8, 1], strides = [1, 1]} : vector<8x24xi32> to vector<8x1xi32>
    %c0_i32_35 = arith.constant 0 : i32
    %c4_i32_36 = arith.constant 4 : i32
    %182 = vector.broadcast %c0_i32_35 : i32 to vector<8x1xi32>
    %183 = arith.maxsi %182, %181 : vector<8x1xi32>
    %184 = vector.broadcast %c4_i32_36 : i32 to vector<8x1xi32>
    %185 = arith.minsi %184, %183 : vector<8x1xi32>
    %c96_i32 = arith.constant 96 : i32
    %186 = vector.broadcast %c96_i32 : i32 to vector<8x1xi32>
    %187 = arith.addi %185, %186 : vector<8x1xi32>
    %188 = vector.broadcast %187 : vector<8x1xi32> to vector<8x128xi32>
    %189 = arith.cmpi eq, %1, %188 : vector<8x128xi32>
    %190 = arith.ori %180, %189 : vector<8x128xi1>
    %191 = vector.extract_strided_slice %0 {offsets = [0, 19], sizes = [8, 1], strides = [1, 1]} : vector<8x24xi32> to vector<8x1xi32>
    %c0_i32_37 = arith.constant 0 : i32
    %c5_i32_38 = arith.constant 5 : i32
    %192 = vector.broadcast %c0_i32_37 : i32 to vector<8x1xi32>
    %193 = arith.maxsi %192, %191 : vector<8x1xi32>
    %194 = vector.broadcast %c5_i32_38 : i32 to vector<8x1xi32>
    %195 = arith.minsi %194, %193 : vector<8x1xi32>
    %c101_i32 = arith.constant 101 : i32
    %196 = vector.broadcast %c101_i32 : i32 to vector<8x1xi32>
    %197 = arith.addi %195, %196 : vector<8x1xi32>
    %198 = vector.broadcast %197 : vector<8x1xi32> to vector<8x128xi32>
    %199 = arith.cmpi eq, %1, %198 : vector<8x128xi32>
    %200 = arith.ori %190, %199 : vector<8x128xi1>
    %201 = vector.extract_strided_slice %0 {offsets = [0, 20], sizes = [8, 1], strides = [1, 1]} : vector<8x24xi32> to vector<8x1xi32>
    %c0_i32_39 = arith.constant 0 : i32
    %c1_i32_40 = arith.constant 1 : i32
    %202 = vector.broadcast %c0_i32_39 : i32 to vector<8x1xi32>
    %203 = arith.maxsi %202, %201 : vector<8x1xi32>
    %204 = vector.broadcast %c1_i32_40 : i32 to vector<8x1xi32>
    %205 = arith.minsi %204, %203 : vector<8x1xi32>
    %c107_i32 = arith.constant 107 : i32
    %206 = vector.broadcast %c107_i32 : i32 to vector<8x1xi32>
    %207 = arith.addi %205, %206 : vector<8x1xi32>
    %208 = vector.broadcast %207 : vector<8x1xi32> to vector<8x128xi32>
    %209 = arith.cmpi eq, %1, %208 : vector<8x128xi32>
    %210 = arith.ori %200, %209 : vector<8x128xi1>
    %211 = vector.extract_strided_slice %0 {offsets = [0, 21], sizes = [8, 1], strides = [1, 1]} : vector<8x24xi32> to vector<8x1xi32>
    %c0_i32_41 = arith.constant 0 : i32
    %c4_i32_42 = arith.constant 4 : i32
    %212 = vector.broadcast %c0_i32_41 : i32 to vector<8x1xi32>
    %213 = arith.maxsi %212, %211 : vector<8x1xi32>
    %214 = vector.broadcast %c4_i32_42 : i32 to vector<8x1xi32>
    %215 = arith.minsi %214, %213 : vector<8x1xi32>
    %c112_i32 = arith.constant 112 : i32
    %216 = vector.broadcast %c112_i32 : i32 to vector<8x1xi32>
    %217 = arith.addi %215, %216 : vector<8x1xi32>
    %218 = vector.broadcast %217 : vector<8x1xi32> to vector<8x128xi32>
    %219 = arith.cmpi eq, %1, %218 : vector<8x128xi32>
    %220 = arith.ori %210, %219 : vector<8x128xi1>
    %221 = vector.extract_strided_slice %0 {offsets = [0, 22], sizes = [8, 1], strides = [1, 1]} : vector<8x24xi32> to vector<8x1xi32>
    %c0_i32_43 = arith.constant 0 : i32
    %c5_i32_44 = arith.constant 5 : i32
    %222 = vector.broadcast %c0_i32_43 : i32 to vector<8x1xi32>
    %223 = arith.maxsi %222, %221 : vector<8x1xi32>
    %224 = vector.broadcast %c5_i32_44 : i32 to vector<8x1xi32>
    %225 = arith.minsi %224, %223 : vector<8x1xi32>
    %c117_i32 = arith.constant 117 : i32
    %226 = vector.broadcast %c117_i32 : i32 to vector<8x1xi32>
    %227 = arith.addi %225, %226 : vector<8x1xi32>
    %228 = vector.broadcast %227 : vector<8x1xi32> to vector<8x128xi32>
    %229 = arith.cmpi eq, %1, %228 : vector<8x128xi32>
    %230 = arith.ori %220, %229 : vector<8x128xi1>
    %231 = vector.extract_strided_slice %0 {offsets = [0, 23], sizes = [8, 1], strides = [1, 1]} : vector<8x24xi32> to vector<8x1xi32>
    %c0_i32_45 = arith.constant 0 : i32
    %c1_i32_46 = arith.constant 1 : i32
    %232 = vector.broadcast %c0_i32_45 : i32 to vector<8x1xi32>
    %233 = arith.maxsi %232, %231 : vector<8x1xi32>
    %234 = vector.broadcast %c1_i32_46 : i32 to vector<8x1xi32>
    %235 = arith.minsi %234, %233 : vector<8x1xi32>
    %c123_i32 = arith.constant 123 : i32
    %236 = vector.broadcast %c123_i32 : i32 to vector<8x1xi32>
    %237 = arith.addi %235, %236 : vector<8x1xi32>
    %238 = vector.broadcast %237 : vector<8x1xi32> to vector<8x128xi32>
    %239 = arith.cmpi eq, %1, %238 : vector<8x128xi32>
    %240 = arith.ori %230, %239 : vector<8x128xi1>
    %241 = arith.extui %240 : vector<8x128xi1> to vector<8x128xi32>
    %242 = arith.sitofp %241 : vector<8x128xi32> to vector<8x128xf32>
    %c0_47 = arith.constant 0 : index
    %c0_48 = arith.constant 0 : index
    %243 = vector.load %arg2[%c0_47, %c0_48] : memref<128x256xf32, #tpu.memory_space<vmem>>, vector<128x256xf32>
    %cst = arith.constant dense<0.000000e+00> : vector<8x256xf32>
    %244 = tpu.matmul %242, %243, %cst {dimension_numbers = #tpu.dot_dimension_numbers<[1], [0], [0], [1], [0, 0, 1, 1], [], []>} : vector<8x128xf32>, vector<128x256xf32>, vector<8x256xf32> -> vector<8x256xf32>
    %c0_49 = arith.constant 0 : index
    %c0_50 = arith.constant 0 : index
    %245 = vector.load %arg3[%c0_49, %c0_50] : memref<8x256xf32, #tpu.memory_space<vmem>>, vector<8x256xf32>
    tpu.vector_store %arg3[%c0_49, %c0_50], %244 {strides = array<i32>} : memref<8x256xf32, #tpu.memory_space<vmem>>, vector<8x256xf32>,
    return
  }
  func.func @transform_0(%arg0: i32) -> (i32, i32) {
    %c0_i32 = arith.constant 0 : i32
    %c0_i32_0 = arith.constant 0 : i32
    return %arg0, %c0_i32 : i32, i32
  }
  func.func @transform_1(%arg0: i32) -> (i32, i32) {
    %c0_i32 = arith.constant 0 : i32
    %c0_i32_0 = arith.constant 0 : i32
    %c0_i32_1 = arith.constant 0 : i32
    return %c0_i32, %c0_i32_0 : i32, i32
  }
  func.func @transform_2(%arg0: i32) -> (i32, i32) {
    %c0_i32 = arith.constant 0 : i32
    %c0_i32_0 = arith.constant 0 : i32
    return %arg0, %c0_i32 : i32, i32
  }
}

</mosaic_0001>

<bundles_post_ra>
// kernel: bond_embedding_forward.1
= control target key start
LH: loop header
LB: loop body
LE: loop exit
PB: predicated region body
PF: predicated region fallthrough
CT: control target
= control target key end

     0   :  { %7 = vsyncpa [#allocation3], 0  ;;  %s399_s9 = smov [#allocation2]   ;;  %s511_s0 = inlined_call_operand.vmem [shape: s32[8,24], index: 0, kind: input, shape index: {}]   ;;  %s512_s1 = inlined_call_operand.hbm [shape: f32[128,256], index: 1, kind: input, shape index: {}]   ;;  %s513_s2 = inlined_call_operand.vmem [shape: f32[8,256], index: 2, kind: output, shape index: {}]  }
   0x1   :  { %s15_s10 = sshll.u32 %s399_s9, 4  ;;  %s375_s13 = scalar_lea.hbm %s512_s1, 4096  ;;  %s16_s10 = int_to_ptr.vmem [resolvable:$true] %s15_s10 }
   0x2   :  { %p376_p0 = scmp.ne.s32.totalorder %s512_s1, %s375_s13  ;;  %p379_p1 = scmp.lt.u32.totalorder %s375_s13, %s512_s1 }
   0x4   :  { %p381_p2 = pnand %p379_p1, %p376_p0 }
   0x6   :  { %384 = shalt.err (!%p381_p2)
}
   0x7   :  { %s385_s18 = scalar_lea.vmem %s16_s10, 4096  ;;  %p390_p4 = scmp.lt.s32.totalorder %s16_s10, %s16_s10 }
   0x8   :  { %p386_p3 = scmp.ne.s32.totalorder %s16_s10, %s385_s18  ;;  %p391_p5 = scmp.lt.s32.totalorder %s385_s18, %s385_s18 }
   0xa   :  { %p392_p6 = por %p391_p5, %p390_p4 }
   0xc   :  { %p393_p7 = pnand %p392_p6, %p386_p3 }
   0xe   :  { %396 = shalt.err (!%p393_p7)
}
   0xf   :  { %s400_s19 = smov 256   ;;  %s401_s20 = smov 16  }
  0x10   :  { %21 = dma.hbm_to_vmem [thread:$0]  %s512_s1, 4096, %s16_s10, [#allocation3], %s400_s19, %s400_s19, %s401_s20  }
  0x11   :  { %397 = dma.done.wait [#allocation3], 4096  }
  0x12   :  { %398 = vsyncadd [#allocation3], 4294963200  ;;  %v402_v0 = vmov 0   ;;  %v403_v1 = vmov 2   ;;  %v25_v2 = vld [vmem:[%s511_s0] sm:$0xff]  ;;  %v404_v10 = vmov 1  }
  0x13   :  { %351 = vset.pattern.permute.xlu0 %v402_v0  ;;  %353 = vset.pattern.permute.xlu1 %v403_v1  ;;  %vm28_vm0 = vcmp.gt.s32.totalorder %v25_v2, 0  ;;  %v405_v11 = vmov 3   ;;  %v406_v14 = vmov 5   ;;  %v407_v15 = vmov 4   ;;  %v181_v40 = vld [vmem:[#allocation2 + $0x8] sm:$0xff]  ;;  %v183_v41 = vld [vmem:[#allocation2 + $0x18] sm:$0xff] }
  0x14   :  { %v29_v3 = vsel %vm28_vm0, %v25_v2, 0  ;;  %v408_v18 = vmov 8   ;;  %v409_v19 = vmov 6   ;;  %v410_v22 = vmov 11   ;;  %v180_v43 = vld [vmem:[#allocation2] sm:$0xff]  ;;  %v182_v44 = vld [vmem:[#allocation2 + $0x10] sm:$0xff] }
  0x15   :  { %vm30_vm1 = vcmp.lt.s32.totalorder %v29_v3, 4  ;;  %vm44_vm2 = vcmp.lt.s32.totalorder %v29_v3, 1  ;;  %vm36_vm3 = vcmp.lt.s32.totalorder %v29_v3, 5  ;;  %v411_v23 = vmov 7   ;;  %v185_v47 = vld [vmem:[#allocation2 + $0x28] sm:$0xff]  ;;  %v187_v48 = vld [vmem:[#allocation2 + $0x38] sm:$0xff] }
  0x16   :  { %v457_v4 = vsel %vm30_vm1, %v29_v3, 4  ;;  %v45_v5 = vsel %vm44_vm2, %v29_v3, 1  ;;  %v459_v6 = vsel %vm36_vm3, %v29_v3, 5  ;;  %v412_v26 = vmov 14   ;;  %v184_v51 = vld [vmem:[#allocation2 + $0x20] sm:$0xff]  ;;  %v186_v52 = vld [vmem:[#allocation2 + $0x30] sm:$0xff] }
  0x17   :  { %33 = vperm.xlu0 %351, %v457_v4   ;;  %v46_v7 = vadd.s32 11, %v45_v5  ;;  %v38_v8 = vadd.s32 5, %v459_v6  ;;  %v52_v9 = vadd.s32 16, %v457_v4  ;;  %v64_v12 = vadd.s32 27, %v45_v5  ;;  %v189_v55 = vld [vmem:[#allocation2 + $0x48] sm:$0xff]  ;;  %v191_v56 = vld [vmem:[#allocation2 + $0x58] sm:$0xff] }
  0x18   :  { %v58_v13 = vadd.s32 21, %v459_v6  ;;  %v82_v16 = vadd.s32 43, %v45_v5  ;;  %v70_v17 = vadd.s32 32, %v457_v4  ;;  %v100_v20 = vadd.s32 59, %v45_v5  ;;  %v188_v58 = vld [vmem:[#allocation2 + $0x40] sm:$0xff]  ;;  %v190_v59 = vld [vmem:[#allocation2 + $0x50] sm:$0xff] }
  0x19   :  { %48 = vperm.xlu1 %353, %v46_v7   ;;  %v76_v21 = vadd.s32 37, %v459_v6  ;;  %v118_v24 = vadd.s32 75, %v45_v5  ;;  %v88_v25 = vadd.s32 48, %v457_v4  ;;  %v413_v27 = vmov 9   ;;  %v193_v63 = vld [vmem:[#allocation2 + $0x68] sm:$0xff]  ;;  %v195_v0 = vld [vmem:[#allocation2 + $0x78] sm:$0xff] }
  0x1a   :  { %v136_v28 = vadd.s32 91, %v45_v5  ;;  %v94_v29 = vadd.s32 53, %v459_v6  ;;  %v414_v30 = vmov 17   ;;  %v415_v31 = vmov 10   ;;  %v192_v2 = vld [vmem:[#allocation2 + $0x60] sm:$0xff]  ;;  %v194_v3 = vld [vmem:[#allocation2 + $0x70] sm:$0xff] }
  0x1b   :  { %352 = vset.pattern.permute.xlu0 %v404_v10  ;;  %v154_v32 = vadd.s32 107, %v45_v5  ;;  %v106_v33 = vadd.s32 64, %v457_v4  ;;  %v416_v34 = vmov 20   ;;  %v417_v35 = vmov 12  }
  0x1c   :  { %40 = vperm.xlu0 %352, %v38_v8   ;;  %v172_v36 = vadd.s32 123, %v45_v5  ;;  %v112_v37 = vadd.s32 69, %v459_v6  ;;  %v418_v38 = vmov 23   ;;  %v419_v39 = vmov 13   ;;  %v197_v8 = vld [vmem:[#allocation2 + $0x88] sm:$0xff] }
  0x1d   :  { %354 = vset.pattern.permute.xlu1 %v405_v11  ;;  %v291_v42 = vpack.c.bf16 %v183_v41, %v181_v40  ;;  %v124_v45 = vadd.s32 80, %v457_v4  ;;  %v293_v46 = vpack.c.bf16 %v182_v44, %v180_v43  ;;  %v420_v49 = vmov 15  }
  0x1e   :  { %54 = vperm.xlu1 %354, %v52_v9   ;;  %v295_v50 = vpack.c.bf16 %v187_v48, %v185_v47  ;;  %v297_v53 = vpack.c.bf16 %v186_v52, %v184_v51  ;;  %v130_v54 = vadd.s32 85, %v459_v6  ;;  %v299_v57 = vpack.c.bf16 %v191_v56, %v189_v55  ;;  %v199_v9 = vld [vmem:[#allocation2 + $0x98] sm:$0xff] }
  0x1f   :  { %292 = vmatprep.subr.bf16.mxu0 %v291_v42  ;;  %v421_v60 = vmov 16   ;;  %v301_v61 = vpack.c.bf16 %v190_v59, %v188_v58  ;;  %v142_v62 = vadd.s32 96, %v457_v4  ;;  %v303_v1 = vpack.c.bf16 %v195_v0, %v193_v63 }
  0x20   :  { %356 = vset.pattern.permute.xlu0 %v406_v14  ;;  %294 = vmatpush1.bf16.msra.mxu0 %v293_v46  ;;  %v305_v5 = vpack.c.bf16 %v194_v3, %v192_v2  ;;  %v422_v7 = vmov 18   ;;  %v148_v10 = vadd.s32 101, %v459_v6  ;;  %v307_v11 = vpack.c.bf16 %v199_v9, %v197_v8 }
  0x21   :  { %66 = vperm.xlu0 %356, %v64_v12   ;;  %296 = vmatprep.subr.bf16.mxu0 %v295_v50  ;;  %v196_v12 = vld [vmem:[#allocation2 + $0x80] sm:$0xff]  ;;  %v26_v44 = vlaneseq }
  0x22   :  { %355 = vset.pattern.permute.xlu1 %v407_v15  ;;  %v423_v15 = vmov 19  }
  0x23   :  { %60 = vperm.xlu1 %355, %v58_v13   ;;  %v198_v13 = vld [vmem:[#allocation2 + $0x90] sm:$0xff]  ;;  %v478_v46 = vand.u32 127, %v26_v44 }
  0x24   :  { %298 = vmatpush1.bf16.msra.mxu0 %v297_v53  ;;  %v309_v14 = vpack.c.bf16 %v198_v13, %v196_v12 }
  0x25   :  { %359 = vset.pattern.permute.xlu0 %v408_v18  ;;  %300 = vmatprep.subr.bf16.mxu0 %v299_v57 }
  0x26   :  { %84 = vperm.xlu0 %359, %v82_v16   ;;  %v201_v16 = vld [vmem:[#allocation2 + $0xa8] sm:$0xff] }
  0x27   :  { %357 = vset.pattern.permute.xlu1 %v409_v19  ;;  %v200_v19 = vld [vmem:[#allocation2 + $0xa0] sm:$0xff] }
  0x28   :  { %72 = vperm.xlu1 %357, %v70_v17   ;;  %302 = vmatpush1.bf16.msra.mxu0 %v301_v61  ;;  %v203_v17 = vld [vmem:[#allocation2 + $0xb8] sm:$0xff] }
  0x29   :  { %304 = vmatprep.subr.bf16.mxu0 %v303_v1  ;;  %v311_v18 = vpack.c.bf16 %v203_v17, %v201_v16 }
  0x2a   :  { %362 = vset.pattern.permute.xlu0 %v410_v22 }
  0x2b   :  { %102 = vperm.xlu0 %362, %v100_v20   ;;  %v202_v20 = vld [vmem:[#allocation2 + $0xb0] sm:$0xff] }
  0x2c   :  { %358 = vset.pattern.permute.xlu1 %v411_v23  ;;  %306 = vmatpush1.bf16.msra.mxu0 %v305_v5  ;;  %v313_v22 = vpack.c.bf16 %v202_v20, %v200_v19  ;;  %v205_v23 = vld [vmem:[#allocation2 + $0xc8] sm:$0xff] }
  0x2d   :  { %78 = vperm.xlu1 %358, %v76_v21   ;;  %308 = vmatprep.subr.bf16.mxu0 %v307_v11  ;;  %v160_v21 = vadd.s32 112, %v457_v4  ;;  %v208_v4 = vld [vmem:[#allocation2 + $0xe0] sm:$0xff] }
  0x2f   :  { %365 = vset.pattern.permute.xlu0 %v412_v26 }
  0x30   :  { %120 = vperm.xlu0 %365, %v118_v24   ;;  %310 = vmatpush1.bf16.msra.mxu0 %v309_v14  ;;  %v207_v24 = vld [vmem:[#allocation2 + $0xd8] sm:$0xff] }
  0x31   :  { %360 = vset.pattern.permute.xlu1 %v413_v27  ;;  %312 = vmatprep.subr.bf16.mxu0 %v311_v18  ;;  %v315_v26 = vpack.c.bf16 %v207_v24, %v205_v23  ;;  %v204_v27 = vld [vmem:[#allocation2 + $0xc0] sm:$0xff] }
  0x32   :  { %90 = vperm.xlu1 %360, %v88_v25   ;;  %v424_v25 = vmov 21  }
  0x34   :  { %368 = vset.pattern.permute.xlu0 %v414_v30  ;;  %314 = vmatpush1.bf16.msra.mxu0 %v313_v22  ;;  %v166_v30 = vadd.s32 117, %v459_v6 }
  0x35   :  { %138 = vperm.xlu0 %368, %v136_v28   ;;  %v206_v28 = vld [vmem:[#allocation2 + $0xd0] sm:$0xff]  ;;  %316 = vmatprep.subr.bf16.mxu0 %v315_v26 }
  0x36   :  { %361 = vset.pattern.permute.xlu1 %v415_v31  ;;  %v209_v31 = vld [vmem:[#allocation2 + $0xe8] sm:$0xff] }
  0x37   :  { %96 = vperm.xlu1 %361, %v94_v29   ;;  %v317_v29 = vpack.c.bf16 %v206_v28, %v204_v27 }
  0x39   :  { %371 = vset.pattern.permute.xlu0 %v416_v34  ;;  %318 = vmatpush1.bf16.msra.mxu0 %v317_v29  ;;  %v210_v34 = vld [vmem:[#allocation2 + $0xf0] sm:$0xff] }
  0x3a   :  { %156 = vperm.xlu0 %371, %v154_v32   ;;  %v211_v32 = vld [vmem:[#allocation2 + $0xf8] sm:$0xff] }
  0x3b   :  { %363 = vset.pattern.permute.xlu1 %v417_v35  ;;  %v425_v35 = vmov 22  }
  0x3c   :  { %108 = vperm.xlu1 %363, %v106_v33   ;;  %v319_v33 = vpack.c.bf16 %v211_v32, %v209_v31 }
  0x3e   :  { %374 = vset.pattern.permute.xlu0 %v418_v38  ;;  %320 = vmatprep.subr.bf16.mxu0 %v319_v33 }
  0x3f   :  { %174 = vperm.xlu0 %374, %v172_v36   ;;  %v321_v36 = vpack.c.bf16 %v210_v34, %v208_v4 }
  0x40   :  { %364 = vset.pattern.permute.xlu1 %v419_v39 }
  0x41   :  { %114 = vperm.xlu1 %364, %v112_v37   ;;  %322 = vmatpush1.bf16.msra.mxu0 %v321_v36  ;;  %v426_v37 = vmov 0.0  }
  0x42   :  { %276 = vmatprep.mubr.f32.mxu0 %v426_v37 }
  0x45   :  { %366 = vset.pattern.permute.xlu1 %v420_v49 }
  0x46   :  { %126 = vperm.xlu1 %366, %v124_v45  }
  0x4a   :  { %367 = vset.pattern.permute.xlu1 %v421_v60 }
  0x4b   :  { %132 = vperm.xlu1 %367, %v130_v54  }
  0x4f   :  { %369 = vset.pattern.permute.xlu1 %v422_v7 }
  0x50   :  { %144 = vperm.xlu1 %369, %v142_v62  }
  0x54   :  { %370 = vset.pattern.permute.xlu1 %v423_v15 }
  0x55   :  { %150 = vperm.xlu1 %370, %v148_v10  }
  0x59   :  { %372 = vset.pattern.permute.xlu1 %v424_v25 }
  0x5a   :  { %162 = vperm.xlu1 %372, %v160_v21  }
  0x5e   :  { %373 = vset.pattern.permute.xlu1 %v425_v35 }
  0x5f   :  { %168 = vperm.xlu1 %373, %v166_v30  }
  0x96   :  { %v34_v42 = vpop.permute.xlu0 %33 }
  0x97   :  { %vm35_vm4 = vcmp.eq.s32.totalorder %v478_v46, %v34_v42 }
  0x98   :  { %v49_v38 = vpop.permute.xlu1 %48 }
  0x99   :  { %vm50_vm7 = vcmp.eq.s32.totalorder %v478_v46, %v49_v38 }
  0x9b   :  { %v41_v45 = vpop.permute.xlu0 %40 }
  0x9c   :  { %vm42_vm5 = vcmp.eq.s32.totalorder %v478_v46, %v41_v45 }
  0x9d   :  { %v55_v39 = vpop.permute.xlu1 %54  ;;  %vm43_vm6 = vmor %vm35_vm4, %vm42_vm5 }
  0x9e   :  { %vm51_vm8 = vmor %vm43_vm6, %vm50_vm7  ;;  %vm56_vm9 = vcmp.eq.s32.totalorder %v478_v46, %v55_v39 }
  0x9f   :  { %vm57_vm11 = vmor %vm51_vm8, %vm56_vm9 }
  0xa0   :  { %v67_v49 = vpop.permute.xlu0 %66 }
  0xa1   :  { %vm68_vm13 = vcmp.eq.s32.totalorder %v478_v46, %v67_v49 }
  0xa2   :  { %v61_v40 = vpop.permute.xlu1 %60 }
  0xa3   :  { %vm62_vm10 = vcmp.eq.s32.totalorder %v478_v46, %v61_v40 }
  0xa4   :  { %vm63_vm12 = vmor %vm57_vm11, %vm62_vm10 }
  0xa5   :  { %v85_v51 = vpop.permute.xlu0 %84  ;;  %vm69_vm0 = vmor %vm63_vm12, %vm68_vm13 }
  0xa6   :  { %vm86_vm3 = vcmp.eq.s32.totalorder %v478_v46, %v85_v51 }
  0xa7   :  { %v73_v6 = vpop.permute.xlu1 %72 }
  0xa8   :  { %vm74_vm14 = vcmp.eq.s32.totalorder %v478_v46, %v73_v6 }
  0xa9   :  { %vm75_vm1 = vmor %vm69_vm0, %vm74_vm14 }
  0xaa   :  { %v103_v53 = vpop.permute.xlu0 %102 }
  0xab   :  { %vm104_vm9 = vcmp.eq.s32.totalorder %v478_v46, %v103_v53 }
  0xac   :  { %v79_v41 = vpop.permute.xlu1 %78 }
  0xad   :  { %vm80_vm15 = vcmp.eq.s32.totalorder %v478_v46, %v79_v41 }
  0xae   :  { %vm81_vm2 = vmor %vm75_vm1, %vm80_vm15 }
  0xaf   :  { %vm87_vm6 = vmor %vm81_vm2, %vm86_vm3  ;;  %v121_v55 = vpop.permute.xlu0 %120 }
  0xb0   :  { %vm122_vm15 = vcmp.eq.s32.totalorder %v478_v46, %v121_v55 }
  0xb1   :  { %v91_v43 = vpop.permute.xlu1 %90 }
  0xb2   :  { %vm92_vm4 = vcmp.eq.s32.totalorder %v478_v46, %v91_v43 }
  0xb3   :  { %vm93_vm7 = vmor %vm87_vm6, %vm92_vm4 }
  0xb4   :  { %v139_v57 = vpop.permute.xlu0 %138 }
  0xb6   :  { %v97_v47 = vpop.permute.xlu1 %96 }
  0xb7   :  { %vm98_vm5 = vcmp.eq.s32.totalorder %v478_v46, %v97_v47 }
  0xb8   :  { %vm99_vm8 = vmor %vm93_vm7, %vm98_vm5  ;;  %vm140_vm5 = vcmp.eq.s32.totalorder %v478_v46, %v139_v57 }
  0xb9   :  { %vm105_vm12 = vmor %vm99_vm8, %vm104_vm9  ;;  %v157_v59 = vpop.permute.xlu0 %156 }
  0xbb   :  { %v109_v48 = vpop.permute.xlu1 %108 }
  0xbc   :  { %vm110_vm10 = vcmp.eq.s32.totalorder %v478_v46, %v109_v48 }
  0xbd   :  { %vm111_vm13 = vmor %vm105_vm12, %vm110_vm10 }
  0xbe   :  { %v175_v61 = vpop.permute.xlu0 %174 }
  0xc0   :  { %v115_v50 = vpop.permute.xlu1 %114 }
  0xc1   :  { %vm116_vm11 = vcmp.eq.s32.totalorder %v478_v46, %v115_v50 }
  0xc2   :  { %vm117_vm14 = vmor %vm111_vm13, %vm116_vm11  ;;  %vm158_vm11 = vcmp.eq.s32.totalorder %v478_v46, %v157_v59 }
  0xc3   :  { %vm123_vm2 = vmor %vm117_vm14, %vm122_vm15  ;;  %vm176_vm14 = vcmp.eq.s32.totalorder %v478_v46, %v175_v61 }
  0xc5   :  { %v127_v52 = vpop.permute.xlu1 %126 }
  0xc6   :  { %vm128_vm0 = vcmp.eq.s32.totalorder %v478_v46, %v127_v52 }
  0xc7   :  { %vm129_vm3 = vmor %vm123_vm2, %vm128_vm0 }
  0xca   :  { %v133_v54 = vpop.permute.xlu1 %132 }
  0xcb   :  { %vm134_vm1 = vcmp.eq.s32.totalorder %v478_v46, %v133_v54 }
  0xcc   :  { %vm135_vm4 = vmor %vm129_vm3, %vm134_vm1 }
  0xcd   :  { %vm141_vm8 = vmor %vm135_vm4, %vm140_vm5 }
  0xcf   :  { %v145_v56 = vpop.permute.xlu1 %144 }
  0xd0   :  { %vm146_vm6 = vcmp.eq.s32.totalorder %v478_v46, %v145_v56 }
  0xd1   :  { %vm147_vm9 = vmor %vm141_vm8, %vm146_vm6 }
  0xd4   :  { %v151_v58 = vpop.permute.xlu1 %150 }
  0xd5   :  { %vm152_vm7 = vcmp.eq.s32.totalorder %v478_v46, %v151_v58 }
  0xd6   :  { %vm153_vm10 = vmor %vm147_vm9, %vm152_vm7 }
  0xd7   :  { %vm159_vm13 = vmor %vm153_vm10, %vm158_vm11 }
  0xd9   :  { %v163_v60 = vpop.permute.xlu1 %162 }
  0xda   :  { %vm164_vm12 = vcmp.eq.s32.totalorder %v478_v46, %v163_v60 }
  0xdb   :  { %vm165_vm15 = vmor %vm159_vm13, %vm164_vm12 }
  0xde   :  { %v169_v62 = vpop.permute.xlu1 %168 }
  0xdf   :  { %vm170_vm0 = vcmp.eq.s32.totalorder %v478_v46, %v169_v62 }
  0xe0   :  { %vm171_vm1 = vmor %vm165_vm15, %vm170_vm0 }
  0xe1   :  { %vm177_vm2 = vmor %vm171_vm1, %vm176_vm14 }
  0xe2   :  { %v290_v63 = vsel %vm177_vm2, 1.0, %v426_v37 }
  0xe3   :  { %277 = vmatmul.mubr.f32.vlgmr.msra.gmra.mrb[0].mxu0 %v290_v63 }
 0x1b6   :  { %v278_v0 = vpop.f32.mrb[0].mxu0 }
 0x1b7   :  { %283 = vst [vmem:[%s513_s2] sm:$0xff] %v278_v0  ;;  %v280_v1 = vpop.f32.mrb[1].mxu0 }
 0x1b8   :  { %284 = vst [vmem:[%s513_s2 + $0x8] sm:$0xff] %v280_v1 }
 0x1b9   :  { %289 = vsyncpa [#allocation3], 1 }

</bundles_post_ra>
